<compile_context>
chip_gen: v6e
topology: v6e:2x2x1
jax: 0.10.0
libtpu: 0.0.40
codegen_flags: <defaults>
</compile_context>

<pallas_src>
import jax
import jax.numpy as jnp
from jax import lax
from jax.experimental import pallas as pl
from jax.experimental.pallas import tpu as pltpu  # noqa: F401  (no grid / default VMEM specs needed)

DIM = 32                     # dim
HEADS = 4                    # num_heads
HEAD_DIM = DIM // HEADS      # 8
MLP_HIDDEN = int(DIM * 4.0)  # 128
SEQ = 8                      # N (tokens per image)
BATCH = 2                    # B
TOKENS = BATCH * SEQ         # 16, all tokens processed in one invocation
STACK = HEADS * TOKENS       # 64, merged-head row count
LN_EPS = 1e-5                # nn.LayerNorm default

assert SEQ & (SEQ - 1) == 0, "block-diag mask uses a shift; SEQ must be a power of 2"
SEQ_SHIFT = SEQ.bit_length() - 1  # rows of the stacked score matrix: (head, batch) block == index >> SEQ_SHIFT

# Per-head block inside the fused qkv output: [q(8) | k(8) | v(8) | pad(8)] = 32 lanes.
HEAD_BLK = 32
QKV_OUT = HEADS * HEAD_BLK   # 128

# Lane offsets inside the packed bf16 weight slab (all 128-aligned).
QKV_OFF = 0                  # (DIM, 128)
PROJ_OFF = 128               # (DIM, 32)
FC1_OFF = 256                # (DIM, 128)
WSLAB_LANES = 384


def _layernorm(x, gamma, beta):
    mu = jnp.mean(x, axis=-1, keepdims=True)
    xc = x - mu
    var = jnp.mean(xc * xc, axis=-1, keepdims=True)
    return xc * jax.lax.rsqrt(var + LN_EPS) * gamma + beta


def _gelu(x):
    # TODO(synk): PyTorch nn.GELU default is the exact erf form; tanh approximation
    # used here for guaranteed Mosaic lowering (max abs deviation ~1e-3).
    c = 0.7978845608028654  # sqrt(2/pi)
    return 0.5 * x * (1.0 + jnp.tanh(c * (x + 0.044715 * x * x * x)))


def block_kernel(xinj_ref, vec_ref, wslab_ref, fc2w_ref, out_ref):
    x = xinj_ref[0]                                  # (TOKENS, C) f32
    inj = xinj_ref[1]                                # (TOKENS, C) f32

    # --- unpack the packed small-parameter slab (one load, one DMA) ---
    vec = vec_ref[...]                               # (8, 128) f32
    g1 = vec[0:1, :DIM]
    b1 = vec[1:2, :DIM]
    pb = vec[2:3, :DIM]                              # proj bias
    g2 = vec[3:4, :DIM]
    b2 = vec[4:5, :DIM]
    f2b = vec[5:6, :DIM]                             # fc2 bias
    f1b = vec[6:7, :MLP_HIDDEN]                      # fc1 bias

    z = x + inj                                      # DEQ injection before norm1
    h = _layernorm(z, g1, b1)

    # ---- Attention (qkv_bias=False, qk_norm=False, eval mode) ----
    # qkv_w columns are head-major ([q|k|v|pad] per head) and the 1/sqrt(hd)
    # scale is pre-folded into the Q columns at init time.
    qkvw = wslab_ref[:, QKV_OFF:QKV_OFF + QKV_OUT]                       # (32, 128) bf16
    qkv = jnp.dot(h.astype(jnp.bfloat16), qkvw,
                  preferred_element_type=jnp.float32)                    # (TOKENS, 128)

    # Stack heads along sublanes: (STACK=64, HEAD_BLK) -> q/k/v lane slices.
    qkv_s = jnp.concatenate(
        [qkv[:, hh * HEAD_BLK:(hh + 1) * HEAD_BLK] for hh in range(HEADS)],
        axis=0)                                                          # (64, 32)
    q = qkv_s[:, 0:HEAD_DIM].astype(jnp.bfloat16)                        # (64, 8), pre-scaled
    k = qkv_s[:, HEAD_DIM:2 * HEAD_DIM].astype(jnp.bfloat16)             # (64, 8)
    v = qkv_s[:, 2 * HEAD_DIM:3 * HEAD_DIM].astype(jnp.bfloat16)         # (64, 8)

    # Combined head + batch block-diagonal additive bias: a row (h, b, s) may only
    # attend to columns with the same head AND the same batch element; with
    # SEQ=8 that is exactly (row >> 3) == (col >> 3).
    ri = lax.broadcasted_iota(jnp.int32, (STACK, STACK), 0)
    ci = lax.broadcasted_iota(jnp.int32, (STACK, STACK), 1)
    same = jnp.right_shift(ri, SEQ_SHIFT) == jnp.right_shift(ci, SEQ_SHIFT)
    bias = jnp.where(same, 0.0, -1e30).astype(jnp.float32)

    # One score matmul (no explicit k.T: contract on K's last dim), one softmax,
    # one PV matmul -- all heads at once.
    s = lax.dot_general(q, k, (((1,), (1,)), ((), ())),
                        preferred_element_type=jnp.float32) + bias       # (64, 64)
    s = s - jnp.max(s, axis=-1, keepdims=True)
    p = jnp.exp(s)
    p = p * pl.reciprocal(jnp.sum(p, axis=-1, keepdims=True), approx=False)
    o_s = jnp.dot(p.astype(jnp.bfloat16), v,
                  preferred_element_type=jnp.float32)                    # (64, 8)

    # Relayout merged-head output back to (TOKENS, C): head h -> lanes h*8:(h+1)*8.
    attn_cat = jnp.concatenate(
        [o_s[hh * TOKENS:(hh + 1) * TOKENS, :] for hh in range(HEADS)],
        axis=1)                                                          # (16, 32)

    projw = wslab_ref[:, PROJ_OFF:PROJ_OFF + DIM]                        # (32, 32) bf16
    attn_out = jnp.dot(attn_cat.astype(jnp.bfloat16), projw,
                       preferred_element_type=jnp.float32) + pb

    # TODO(synk): residual uses the pre-injection x (x + attn_out); the source
    # forward is NotImplementedError so this is the assumed DEQ convention.
    x = x + attn_out                                 # residual 1

    # ---- MLP (fc1 -> GELU -> fc2) ----
    h2 = _layernorm(x, g2, b2)
    fc1w = wslab_ref[:, FC1_OFF:FC1_OFF + MLP_HIDDEN]                    # (32, 128) bf16
    m = jnp.dot(h2.astype(jnp.bfloat16), fc1w,
                preferred_element_type=jnp.float32) + f1b                # (16, 128)
    m = _gelu(m)
    m = jnp.dot(m.astype(jnp.bfloat16), fc2w_ref[...],
                preferred_element_type=jnp.float32) + f2b                # (16, 32)

    out_ref[...] = (x + m).astype(out_ref.dtype)     # residual 2


def run_block(x, injection, params):
    B, N, C = x.shape
    # Stack x and injection into ONE input array -> one DMA instead of two.
    xinj = jnp.stack([x.reshape(B * N, C), injection.reshape(B * N, C)], axis=0)
    vec, wslab, fc2_w = params
    out = pl.pallas_call(
        block_kernel,
        out_shape=jax.ShapeDtypeStruct((B * N, C), jnp.float32),
        # No grid: the whole problem (~35 KB of activations + weights) is VMEM
        # resident; nothing to pipeline, nothing worth splitting across cores.
    )(xinj, vec, wslab, fc2_w)
    return out.reshape(B, N, C)


def init_params(key):
    ks = jax.random.split(key, 4)
    std = 0.02
    scale = HEAD_DIM ** -0.5

    # Weights stored transposed (in_features, out_features): y = x @ W.
    qkv_w = std * jax.random.normal(ks[0], (DIM, 3 * DIM), jnp.float32)
    proj_w = std * jax.random.normal(ks[1], (DIM, DIM), jnp.float32)
    fc1_w = std * jax.random.normal(ks[2], (DIM, MLP_HIDDEN), jnp.float32)
    fc2_w = std * jax.random.normal(ks[3], (MLP_HIDDEN, DIM), jnp.float32)

    g1 = jnp.ones((DIM,), jnp.float32)
    b1 = jnp.zeros((DIM,), jnp.float32)
    proj_b = jnp.zeros((DIM,), jnp.float32)
    g2 = jnp.ones((DIM,), jnp.float32)
    b2 = jnp.zeros((DIM,), jnp.float32)
    fc1_b = jnp.zeros((MLP_HIDDEN,), jnp.float32)
    fc2_b = jnp.zeros((DIM,), jnp.float32)

    # Pack all small vectors into one (8, 128) slab -> one DMA instead of seven.
    vec = jnp.zeros((8, 128), jnp.float32)
    vec = vec.at[0, :DIM].set(g1)
    vec = vec.at[1, :DIM].set(b1)
    vec = vec.at[2, :DIM].set(proj_b)
    vec = vec.at[3, :DIM].set(g2)
    vec = vec.at[4, :DIM].set(b2)
    vec = vec.at[5, :DIM].set(fc2_b)
    vec = vec.at[6, :MLP_HIDDEN].set(fc1_b)

    # Reorder qkv_w columns to head-major blocks [q_h | k_h | v_h | pad] (32 lanes
    # each) and fold the attention scale into the Q columns.
    wq = qkv_w[:, :DIM] * scale
    wk = qkv_w[:, DIM:2 * DIM]
    wv = qkv_w[:, 2 * DIM:]
    pad = jnp.zeros((DIM, HEAD_BLK - 3 * HEAD_DIM), jnp.float32)
    head_blocks = []
    for hh in range(HEADS):
        sl = slice(hh * HEAD_DIM, (hh + 1) * HEAD_DIM)
        head_blocks.append(jnp.concatenate([wq[:, sl], wk[:, sl], wv[:, sl], pad], axis=1))
    qkv_hm = jnp.concatenate(head_blocks, axis=1)               # (32, 128)

    # Pack qkv / proj / fc1 into one bf16 slab at 128-lane-aligned offsets
    # -> one weight DMA; fc2 (128 rows) stays separate.
    wslab = jnp.zeros((DIM, WSLAB_LANES), jnp.float32)
    wslab = wslab.at[:, QKV_OFF:QKV_OFF + QKV_OUT].set(qkv_hm)
    wslab = wslab.at[:, PROJ_OFF:PROJ_OFF + DIM].set(proj_w)
    wslab = wslab.at[:, FC1_OFF:FC1_OFF + MLP_HIDDEN].set(fc1_w)

    wdt = jnp.bfloat16   # bf16 weights: single MXU pass, half the DMA bytes
    return (vec, wslab.astype(wdt), fc2_w.astype(wdt))


if __name__ == "__main__":
    key = jax.random.PRNGKey(0)
    kx, kinj, kp = jax.random.split(key, 3)
    x = jax.random.normal(kx, (BATCH, SEQ, DIM), jnp.float32)
    injection = jax.random.normal(kinj, (BATCH, SEQ, DIM), jnp.float32)
    params = init_params(kp)

    out = run_block(x, injection, params)
    out = jax.block_until_ready(out)
    assert out.shape == (BATCH, SEQ, DIM)
    assert bool(jnp.all(jnp.isfinite(out)))
    print("KERNEL_OK")
</pallas_src>

<mosaic_0001>
module attributes {stable_mosaic.version = 11 : i64} {
  func.func @block_kernel(%arg0: memref<2x16x32xf32, #tpu.memory_space<vmem>>, %arg1: memref<8x128xf32, #tpu.memory_space<vmem>>, %arg2: memref<32x384xbf16, #tpu.memory_space<vmem>>, %arg3: memref<128x32xbf16, #tpu.memory_space<vmem>>, %arg4: memref<16x32xf32, #tpu.memory_space<vmem>>) attributes {dimension_semantics = [], scalar_prefetch = 0 : i64, scratch_operands = 0 : i64, tpu.core_type = #tpu.core_type<tc>} {
    %c0 = arith.constant 0 : index
    %c0_0 = arith.constant 0 : index
    %c0_1 = arith.constant 0 : index
    %0 = vector.load %arg0[%c0, %c0_0, %c0_1] : memref<2x16x32xf32, #tpu.memory_space<vmem>>, vector<1x16x32xf32>
    %1 = vector.shape_cast %0 : vector<1x16x32xf32> to vector<16x32xf32>
    %c1 = arith.constant 1 : index
    %c0_2 = arith.constant 0 : index
    %c0_3 = arith.constant 0 : index
    %2 = vector.load %arg0[%c1, %c0_2, %c0_3] : memref<2x16x32xf32, #tpu.memory_space<vmem>>, vector<1x16x32xf32>
    %3 = vector.shape_cast %2 : vector<1x16x32xf32> to vector<16x32xf32>
    %c0_4 = arith.constant 0 : index
    %c0_5 = arith.constant 0 : index
    %4 = vector.load %arg1[%c0_4, %c0_5] : memref<8x128xf32, #tpu.memory_space<vmem>>, vector<8x128xf32>
    %5 = vector.extract_strided_slice %4 {offsets = [0, 0], sizes = [1, 32], strides = [1, 1]} : vector<8x128xf32> to vector<1x32xf32>
    %6 = vector.extract_strided_slice %4 {offsets = [1, 0], sizes = [1, 32], strides = [1, 1]} : vector<8x128xf32> to vector<1x32xf32>
    %7 = vector.extract_strided_slice %4 {offsets = [2, 0], sizes = [1, 32], strides = [1, 1]} : vector<8x128xf32> to vector<1x32xf32>
    %8 = vector.extract_strided_slice %4 {offsets = [3, 0], sizes = [1, 32], strides = [1, 1]} : vector<8x128xf32> to vector<1x32xf32>
    %9 = vector.extract_strided_slice %4 {offsets = [4, 0], sizes = [1, 32], strides = [1, 1]} : vector<8x128xf32> to vector<1x32xf32>
    %10 = vector.extract_strided_slice %4 {offsets = [5, 0], sizes = [1, 32], strides = [1, 1]} : vector<8x128xf32> to vector<1x32xf32>
    %11 = vector.extract_strided_slice %4 {offsets = [6, 0], sizes = [1, 128], strides = [1, 1]} : vector<8x128xf32> to vector<1x128xf32>
    %12 = arith.addf %1, %3 : vector<16x32xf32>
    %cst = arith.constant dense<0.000000e+00> : vector<16xf32>
    %13 = vector.multi_reduction <add>, %12, %cst [1] : vector<16x32xf32> to vector<16xf32>
    %14 = vector.shape_cast %13 : vector<16xf32> to vector<16x1xf32>
    %cst_6 = arith.constant 3.200000e+01 : f32
    %15 = vector.broadcast %cst_6 : f32 to vector<16x1xf32>
    %16 = arith.divf %14, %15 : vector<16x1xf32>
    %17 = vector.broadcast %16 : vector<16x1xf32> to vector<16x32xf32>
    %18 = arith.subf %12, %17 : vector<16x32xf32>
    %19 = arith.mulf %18, %18 : vector<16x32xf32>
    %cst_7 = arith.constant dense<0.000000e+00> : vector<16xf32>
    %20 = vector.multi_reduction <add>, %19, %cst_7 [1] : vector<16x32xf32> to vector<16xf32>
    %21 = vector.shape_cast %20 : vector<16xf32> to vector<16x1xf32>
    %cst_8 = arith.constant 3.200000e+01 : f32
    %22 = vector.broadcast %cst_8 : f32 to vector<16x1xf32>
    %23 = arith.divf %21, %22 : vector<16x1xf32>
    %cst_9 = arith.constant 9.99999974E-6 : f32
    %24 = vector.broadcast %cst_9 : f32 to vector<16x1xf32>
    %25 = arith.addf %23, %24 : vector<16x1xf32>
    %26 = math.rsqrt %25 : vector<16x1xf32>
    %27 = vector.broadcast %26 : vector<16x1xf32> to vector<16x32xf32>
    %28 = arith.mulf %18, %27 : vector<16x32xf32>
    %29 = vector.broadcast %5 : vector<1x32xf32> to vector<16x32xf32>
    %30 = arith.mulf %28, %29 : vector<16x32xf32>
    %31 = vector.broadcast %6 : vector<1x32xf32> to vector<16x32xf32>
    %32 = arith.addf %30, %31 : vector<16x32xf32>
    %c0_10 = arith.constant 0 : index
    %c0_11 = arith.constant 0 : index
    %33 = vector.load %arg2[%c0_10, %c0_11] : memref<32x384xbf16, #tpu.memory_space<vmem>>, vector<32x128xbf16>
    %34 = arith.truncf %32 : vector<16x32xf32> to vector<16x32xbf16>
    %cst_12 = arith.constant dense<0.000000e+00> : vector<16x128xf32>
    %35 = tpu.matmul %34, %33, %cst_12 {dimension_numbers = #tpu.dot_dimension_numbers<[1], [0], [0], [1], [0, 0, 1, 1], [], []>} : vector<16x32xbf16>, vector<32x128xbf16>, vector<16x128xf32> -> vector<16x128xf32>
    %36 = vector.extract_strided_slice %35 {offsets = [0, 0], sizes = [16, 32], strides = [1, 1]} : vector<16x128xf32> to vector<16x32xf32>
    %37 = vector.extract_strided_slice %35 {offsets = [0, 32], sizes = [16, 32], strides = [1, 1]} : vector<16x128xf32> to vector<16x32xf32>
    %38 = vector.extract_strided_slice %35 {offsets = [0, 64], sizes = [16, 32], strides = [1, 1]} : vector<16x128xf32> to vector<16x32xf32>
    %39 = vector.extract_strided_slice %35 {offsets = [0, 96], sizes = [16, 32], strides = [1, 1]} : vector<16x128xf32> to vector<16x32xf32>
    %40 = tpu.concatenate %36, %37, %38, %39 in 0 : vector<16x32xf32>, vector<16x32xf32>, vector<16x32xf32>, vector<16x32xf32> -> vector<64x32xf32>
    %41 = vector.extract_strided_slice %40 {offsets = [0, 0], sizes = [64, 8], strides = [1, 1]} : vector<64x32xf32> to vector<64x8xf32>
    %42 = arith.truncf %41 : vector<64x8xf32> to vector<64x8xbf16>
    %43 = vector.extract_strided_slice %40 {offsets = [0, 8], sizes = [64, 8], strides = [1, 1]} : vector<64x32xf32> to vector<64x8xf32>
    %44 = arith.truncf %43 : vector<64x8xf32> to vector<64x8xbf16>
    %45 = vector.extract_strided_slice %40 {offsets = [0, 16], sizes = [64, 8], strides = [1, 1]} : vector<64x32xf32> to vector<64x8xf32>
    %46 = arith.truncf %45 : vector<64x8xf32> to vector<64x8xbf16>
    %47 = tpu.iota {dimensions = array<i32: 0>} : vector<64x64xi32>
    %48 = tpu.iota {dimensions = array<i32: 1>} : vector<64x64xi32>
    %c3_i32 = arith.constant 3 : i32
    %49 = vector.broadcast %c3_i32 : i32 to vector<64x64xi32>
    %50 = arith.shrsi %47, %49 : vector<64x64xi32>
    %c3_i32_13 = arith.constant 3 : i32
    %51 = vector.broadcast %c3_i32_13 : i32 to vector<64x64xi32>
    %52 = arith.shrsi %48, %51 : vector<64x64xi32>
    %53 = arith.cmpi eq, %50, %52 : vector<64x64xi32>
    %cst_14 = arith.constant 0.000000e+00 : f32
    %cst_15 = arith.constant -1.000000e+30 : f32
    %54 = vector.broadcast %cst_14 : f32 to vector<64x64xf32>
    %55 = vector.broadcast %cst_15 : f32 to vector<64x64xf32>
    %56 = arith.select %53, %54, %55 : vector<64x64xi1>, vector<64x64xf32>
    %cst_16 = arith.constant dense<0.000000e+00> : vector<64x64xf32>
    %57 = tpu.matmul %42, %44, %cst_16 {dimension_numbers = #tpu.dot_dimension_numbers<[1], [1], [0], [0], [0, 0, 1, 0], [], []>} : vector<64x8xbf16>, vector<64x8xbf16>, vector<64x64xf32> -> vector<64x64xf32>
    %58 = arith.addf %57, %56 : vector<64x64xf32>
    %cst_17 = arith.constant dense<0xFF800000> : vector<64xf32>
    %59 = vector.multi_reduction <maximumf>, %58, %cst_17 [1] : vector<64x64xf32> to vector<64xf32>
    %60 = vector.shape_cast %59 : vector<64xf32> to vector<64x1xf32>
    %61 = vector.broadcast %60 : vector<64x1xf32> to vector<64x64xf32>
    %62 = arith.subf %58, %61 : vector<64x64xf32>
    %63 = math.exp %62 : vector<64x64xf32>
    %cst_18 = arith.constant dense<0.000000e+00> : vector<64xf32>
    %64 = vector.multi_reduction <add>, %63, %cst_18 [1] : vector<64x64xf32> to vector<64xf32>
    %65 = vector.shape_cast %64 : vector<64xf32> to vector<64x1xf32>
    %66 = tpu.reciprocal %65 : vector<64x1xf32> -> vector<64x1xf32>
    %67 = vector.broadcast %66 : vector<64x1xf32> to vector<64x64xf32>
    %68 = arith.mulf %63, %67 : vector<64x64xf32>
    %69 = arith.truncf %68 : vector<64x64xf32> to vector<64x64xbf16>
    %cst_19 = arith.constant dense<0.000000e+00> : vector<64x8xf32>
    %70 = tpu.matmul %69, %46, %cst_19 {dimension_numbers = #tpu.dot_dimension_numbers<[1], [0], [0], [1], [0, 0, 1, 1], [], []>} : vector<64x64xbf16>, vector<64x8xbf16>, vector<64x8xf32> -> vector<64x8xf32>
    %71 = vector.extract_strided_slice %70 {offsets = [0, 0], sizes = [16, 8], strides = [1, 1]} : vector<64x8xf32> to vector<16x8xf32>
    %72 = vector.extract_strided_slice %70 {offsets = [16, 0], sizes = [16, 8], strides = [1, 1]} : vector<64x8xf32> to vector<16x8xf32>
    %73 = vector.extract_strided_slice %70 {offsets = [32, 0], sizes = [16, 8], strides = [1, 1]} : vector<64x8xf32> to vector<16x8xf32>
    %74 = vector.extract_strided_slice %70 {offsets = [48, 0], sizes = [16, 8], strides = [1, 1]} : vector<64x8xf32> to vector<16x8xf32>
    %75 = tpu.concatenate %71, %72, %73, %74 in 1 : vector<16x8xf32>, vector<16x8xf32>, vector<16x8xf32>, vector<16x8xf32> -> vector<16x32xf32>
    %c0_20 = arith.constant 0 : index
    %c128 = arith.constant 128 : index
    %76 = vector.load %arg2[%c0_20, %c128] : memref<32x384xbf16, #tpu.memory_space<vmem>>, vector<32x32xbf16>
    %77 = arith.truncf %75 : vector<16x32xf32> to vector<16x32xbf16>
    %cst_21 = arith.constant dense<0.000000e+00> : vector<16x32xf32>
    %78 = tpu.matmul %77, %76, %cst_21 {dimension_numbers = #tpu.dot_dimension_numbers<[1], [0], [0], [1], [0, 0, 1, 1], [], []>} : vector<16x32xbf16>, vector<32x32xbf16>, vector<16x32xf32> -> vector<16x32xf32>
    %79 = vector.broadcast %7 : vector<1x32xf32> to vector<16x32xf32>
    %80 = arith.addf %78, %79 : vector<16x32xf32>
    %81 = arith.addf %1, %80 : vector<16x32xf32>
    %cst_22 = arith.constant dense<0.000000e+00> : vector<16xf32>
    %82 = vector.multi_reduction <add>, %81, %cst_22 [1] : vector<16x32xf32> to vector<16xf32>
    %83 = vector.shape_cast %82 : vector<16xf32> to vector<16x1xf32>
    %cst_23 = arith.constant 3.200000e+01 : f32
    %84 = vector.broadcast %cst_23 : f32 to vector<16x1xf32>
    %85 = arith.divf %83, %84 : vector<16x1xf32>
    %86 = vector.broadcast %85 : vector<16x1xf32> to vector<16x32xf32>
    %87 = arith.subf %81, %86 : vector<16x32xf32>
    %88 = arith.mulf %87, %87 : vector<16x32xf32>
    %cst_24 = arith.constant dense<0.000000e+00> : vector<16xf32>
    %89 = vector.multi_reduction <add>, %88, %cst_24 [1] : vector<16x32xf32> to vector<16xf32>
    %90 = vector.shape_cast %89 : vector<16xf32> to vector<16x1xf32>
    %cst_25 = arith.constant 3.200000e+01 : f32
    %91 = vector.broadcast %cst_25 : f32 to vector<16x1xf32>
    %92 = arith.divf %90, %91 : vector<16x1xf32>
    %cst_26 = arith.constant 9.99999974E-6 : f32
    %93 = vector.broadcast %cst_26 : f32 to vector<16x1xf32>
    %94 = arith.addf %92, %93 : vector<16x1xf32>
    %95 = math.rsqrt %94 : vector<16x1xf32>
    %96 = vector.broadcast %95 : vector<16x1xf32> to vector<16x32xf32>
    %97 = arith.mulf %87, %96 : vector<16x32xf32>
    %98 = vector.broadcast %8 : vector<1x32xf32> to vector<16x32xf32>
    %99 = arith.mulf %97, %98 : vector<16x32xf32>
    %100 = vector.broadcast %9 : vector<1x32xf32> to vector<16x32xf32>
    %101 = arith.addf %99, %100 : vector<16x32xf32>
    %c0_27 = arith.constant 0 : index
    %c256 = arith.constant 256 : index
    %102 = vector.load %arg2[%c0_27, %c256] : memref<32x384xbf16, #tpu.memory_space<vmem>>, vector<32x128xbf16>
    %103 = arith.truncf %101 : vector<16x32xf32> to vector<16x32xbf16>
    %cst_28 = arith.constant dense<0.000000e+00> : vector<16x128xf32>
    %104 = tpu.matmul %103, %102, %cst_28 {dimension_numbers = #tpu.dot_dimension_numbers<[1], [0], [0], [1], [0, 0, 1, 1], [], []>} : vector<16x32xbf16>, vector<32x128xbf16>, vector<16x128xf32> -> vector<16x128xf32>
    %105 = vector.broadcast %11 : vector<1x128xf32> to vector<16x128xf32>
    %106 = arith.addf %104, %105 : vector<16x128xf32>
    %cst_29 = arith.constant 5.000000e-01 : f32
    %107 = vector.broadcast %cst_29 : f32 to vector<16x128xf32>
    %108 = arith.mulf %107, %106 : vector<16x128xf32>
    %cst_30 = arith.constant 4.471500e-02 : f32
    %109 = vector.broadcast %cst_30 : f32 to vector<16x128xf32>
    %110 = arith.mulf %109, %106 : vector<16x128xf32>
    %111 = arith.mulf %110, %106 : vector<16x128xf32>
    %112 = arith.mulf %111, %106 : vector<16x128xf32>
    %113 = arith.addf %106, %112 : vector<16x128xf32>
    %cst_31 = arith.constant 0.797884583 : f32
    %114 = vector.broadcast %cst_31 : f32 to vector<16x128xf32>
    %115 = arith.mulf %114, %113 : vector<16x128xf32>
    %116 = math.tanh %115 : vector<16x128xf32>
    %cst_32 = arith.constant 1.000000e+00 : f32
    %117 = vector.broadcast %cst_32 : f32 to vector<16x128xf32>
    %118 = arith.addf %117, %116 : vector<16x128xf32>
    %119 = arith.mulf %108, %118 : vector<16x128xf32>
    %120 = arith.truncf %119 : vector<16x128xf32> to vector<16x128xbf16>
    %c0_33 = arith.constant 0 : index
    %c0_34 = arith.constant 0 : index
    %121 = vector.load %arg3[%c0_33, %c0_34] : memref<128x32xbf16, #tpu.memory_space<vmem>>, vector<128x32xbf16>
    %cst_35 = arith.constant dense<0.000000e+00> : vector<16x32xf32>
    %122 = tpu.matmul %120, %121, %cst_35 {dimension_numbers = #tpu.dot_dimension_numbers<[1], [0], [0], [1], [0, 0, 1, 1], [], []>} : vector<16x128xbf16>, vector<128x32xbf16>, vector<16x32xf32> -> vector<16x32xf32>
    %123 = vector.broadcast %10 : vector<1x32xf32> to vector<16x32xf32>
    %124 = arith.addf %122, %123 : vector<16x32xf32>
    %125 = arith.addf %81, %124 : vector<16x32xf32>
    %c0_36 = arith.constant 0 : index
    %c0_37 = arith.constant 0 : index
    %126 = vector.load %arg4[%c0_36, %c0_37] : memref<16x32xf32, #tpu.memory_space<vmem>>, vector<16x32xf32>
    tpu.vector_store %arg4[%c0_36, %c0_37], %125 {strides = array<i32>} : memref<16x32xf32, #tpu.memory_space<vmem>>, vector<16x32xf32>,
    return
  }
}

</mosaic_0001>

<bundles_post_ra>
// kernel: tpu_custom_call.1
= control target key start
LH: loop header
LB: loop body
LE: loop exit
PB: predicated region body
PF: predicated region fallthrough
CT: control target
= control target key end

     0   :  { %9 = vsyncpa [#allocation3], 0  ;;  %s1370_s0 = inlined_call_operand.vmem [shape: f32[2,16,32], index: 0, kind: input, shape index: {}]   ;;  %s1371_s1 = inlined_call_operand.hbm [shape: f32[8,128], index: 1, kind: input, shape index: {}]   ;;  %s1372_s2 = inlined_call_operand.vmem [shape: bf16[32,384], index: 2, kind: input, shape index: {}]   ;;  %s1373_s3 = inlined_call_operand.vmem [shape: bf16[128,32], index: 3, kind: input, shape index: {}]   ;;  %s1374_s4 = inlined_call_operand.hbm [shape: f32[16,32], index: 4, kind: output, shape index: {}]  }
   0x1   :  { %10 = vsyncpa [#allocation4], 0  ;;  %s1122_s15 = smov [#allocation2]  }
   0x2   :  { %s19_s16 = sshll.u32 %s1122_s15, 4  ;;  %s20_s16 = int_to_ptr.vmem [resolvable:$true] %s19_s16 }
   0x3   :  { %s1086_s17 = scalar_lea.vmem %s20_s16, 128  ;;  %p1091_p1 = scmp.lt.s32.totalorder %s20_s16, %s20_s16 }
   0x4   :  { %p1087_p0 = scmp.ne.s32.totalorder %s20_s16, %s1086_s17  ;;  %p1092_p2 = scmp.lt.s32.totalorder %s1086_s17, %s1086_s17 }
   0x6   :  { %p1093_p3 = por %p1092_p2, %p1091_p1 }
   0x8   :  { %p1094_p4 = pnand %p1093_p3, %p1087_p0 }
   0xa   :  { %1097 = shalt.err (!%p1094_p4)
}
   0xb   :  { %22 = dma.hbm_to_vmem [thread:$0]  %s1371_s1, 128, %s20_s16, [#allocation3]  }
   0xc   :  { %1118 = dma.done.wait [#allocation3], 128  }
   0xd   :  { %1119 = vsyncadd [#allocation3], 4294967168  ;;  %v1167_v0 = vld [vmem:[%s1370_s0] sm:$0xff]  ;;  %v835_v1 = vld [vmem:[%s1370_s0 + $0x10] sm:$0xff]  ;;  %vm39_vm0 = vcmask 261120   ;;  %v1123_v19 = vmov 0.0   ;;  %v67_v27 = vlaneseq }
   0xe   :  { %v1175_v2 = vld [vmem:[%s1370_s0 + $0x8] sm:$0xff]  ;;  %v37_v3 = vadd.f32 %v835_v1, %v1167_v0  ;;  %v836_v4 = vld [vmem:[%s1370_s0 + $0x18] sm:$0xff]  ;;  %896 = vmatprep.subr.bf16.mxu0 %v1123_v19  ;;  %vm1124_vm1 = vmmov 0   ;;  %v1200_v30 = vld [vmem:[#allocation2] sm:$0xff]  ;;  %vm212_vm2 = vcmask 64512   ;;  %s1125_s30 = smov 64  }
   0xf   :  { %v38_v5 = vadd.f32 %v836_v4, %v1175_v2  ;;  %v1020_v18 = vld [vmem:[%s1372_s2 + $0x18] ss:$12 sps:$4 sm:$0xff]   ;;  %900 = vmatprep.mubr.msk.bf16.mxu0 %vm1124_vm1, %v1123_v19  ;;  %v1021_v20 = vld [vmem:[%s1372_s2] ss:$12 sps:$4 sm:$0xff]   ;;  %v1197_v28 = vshrl.u32 %v67_v27, 7  ;;  %s1126_s5 = smov 32  }
  0x10   :  { %v40_v6 = vsel %vm39_vm0, %v37_v3, 0.0  ;;  %897 = vmatpush3.bf16.msra.mxu0 %v1020_v18  ;;  %s1127_s6 = smov 96   ;;  %s1128_s7 = smov 120   ;;  %vm302_vm5 = vcmask 523264   ;;  %vm510_vm12 = vcmask 130048   ;;  %vm513_vm13 = vcmask 195584  }
  0x11   :  { %41 = vadd.xlane.f32.xlu0 %v40_v6  ;;  %v43_v7 = vsel %vm39_vm0, %v38_v5, 0.0  ;;  %898 = vmatprep.subr.bf16.mxu0 %v1123_v19  ;;  %v69_v29 = vsub.s32 0, %v1197_v28  ;;  %v75_v34 = vsub.s32 1, %v1197_v28  ;;  %s1130_s8 = smov 112   ;;  %s1131_s13 = smov 8  }
  0x12   :  { %s1132_s14 = smov 24   ;;  %s1133_s15 = smov 16  }
  0x13   :  { %v70_v33 = vrot.slane %v1200_v30, %v69_v29  ;;  %v76_v38 = vrot.slane %v1200_v30, %v75_v34 }
  0x14   :  { %899 = vmatpush3.bf16.msra.mxu0 %v1021_v20  ;;  %v171_v20 = vadd.s32 48, %v1197_v28 }
  0x15   :  { %44 = vadd.xlane.f32.xlu0 %v43_v7  ;;  %v167_v7 = vadd.s32 16, %v1197_v28 }
  0x9a   :  { %v42_v8 = vpop.xlane.xlu0 %41 }
  0x9b   :  { %v47_v9 = vmul.f32 0.03125, %v42_v8  ;;  %v174_v8 = vand.u32 127, %v67_v27 }
  0x9d   :  { %v49_v10 = vsub.f32 %v37_v3, %v47_v9  ;;  %v177_v9 = vshra.s32 %v167_v7, 3 }
  0x9e   :  { %v45_v11 = vpop.xlane.xlu0 %44 }
  0x9f   :  { %v48_v12 = vmul.f32 0.03125, %v45_v11  ;;  %v51_v13 = vmul.f32 %v49_v10, %v49_v10  ;;  %v175_v11 = vshra.s32 %v1197_v28, 3 }
  0xa1   :  { %v50_v14 = vsub.f32 %v38_v5, %v48_v12  ;;  %v53_v15 = vsel %vm39_vm0, %v51_v13, 0.0  ;;  %v166_v12 = vadd.s32 8, %v1197_v28  ;;  %v168_v13 = vadd.s32 24, %v1197_v28 }
  0xa2   :  { %54 = vadd.xlane.f32.xlu1 %v53_v15  ;;  %v169_v15 = vadd.s32 32, %v1197_v28 }
  0xa3   :  { %v52_v16 = vmul.f32 %v50_v14, %v50_v14  ;;  %v178_v18 = vshra.s32 %v168_v13, 3 }
  0xa5   :  { %v56_v17 = vsel %vm39_vm0, %v52_v16, 0.0  ;;  %v1129_v16 = vmov -1e+30  }
  0xa6   :  { %57 = vadd.xlane.f32.xlu1 %v56_v17 }
 0x12b   :  { %v55_v21 = vpop.xlane.xlu1 %54 }
 0x12c   :  { %v59_v22 = vmul.f32 0.03125, %v55_v21 }
 0x12e   :  { %v61_v23 = vadd.f32 1e-05, %v59_v22 }
 0x12f   :  { %v58_v24 = vpop.xlane.xlu1 %57 }
 0x130   :  { %1034 = vrsqrt.f32 %v61_v23  ;;  %v60_v25 = vmul.f32 0.03125, %v58_v24  ;;  %v179_v24 = vshra.s32 %v169_v15, 3 }
 0x132   :  { %v62_v26 = vadd.f32 1e-05, %v60_v25  ;;  %v170_v25 = vadd.s32 40, %v1197_v28 }
 0x134   :  { %1036 = vrsqrt.f32 %v62_v26 }
 0x13d   :  { %v1035_v31 = vpop.eup %1034 }
 0x13e   :  { %v65_v32 = vmul.f32 %v1035_v31, %v49_v10  ;;  %v183_v10 = vshra.s32 %v174_v8, 3  ;;  %v181_v31 = vshra.s32 %v171_v20, 3 }
 0x140   :  { %v71_v37 = vmul.f32 %v70_v33, %v65_v32  ;;  %vm186_vm3 = vcmp.eq.s32.totalorder %v177_v9, %v183_v10  ;;  %vm184_vm4 = vcmp.eq.s32.totalorder %v175_v11, %v183_v10  ;;  %vm187_vm7 = vcmp.eq.s32.totalorder %v178_v18, %v183_v10 }
 0x141   :  { %v1037_v35 = vpop.eup %1036  ;;  %v194_v17 = vsel %vm186_vm3, 0.0, %v1129_v16  ;;  %v192_v22 = vsel %vm184_vm4, 0.0, %v1129_v16  ;;  %v172_v32 = vadd.s32 56, %v1197_v28  ;;  %vm188_vm8 = vcmp.eq.s32.totalorder %v179_v24, %v183_v10 }
 0x142   :  { %v66_v36 = vmul.f32 %v1037_v35, %v50_v14  ;;  %v77_v40 = vadd.f32 %v76_v38, %v71_v37  ;;  %v176_v14 = vshra.s32 %v166_v12, 3  ;;  %v195_v37 = vsel %vm187_vm7, 0.0, %v1129_v16 }
 0x143   :  { %vm190_vm9 = vcmp.eq.s32.totalorder %v181_v31, %v183_v10 }
 0x144   :  { %v72_v39 = vmul.f32 %v70_v33, %v66_v36  ;;  %vm185_vm6 = vcmp.eq.s32.totalorder %v176_v14, %v183_v10  ;;  %v180_v36 = vshra.s32 %v170_v25, 3 }
 0x145   :  { %v193_v34 = vsel %vm185_vm6, 0.0, %v1129_v16 }
 0x146   :  { %v78_v41 = vadd.f32 %v76_v38, %v72_v39  ;;  %vm189_vm10 = vcmp.eq.s32.totalorder %v180_v36, %v183_v10 }
 0x148   :  { %v83_v42 = vpack.c.bf16 %v78_v41, %v77_v40  ;;  %v182_v40 = vshra.s32 %v172_v32, 3 }
 0x14a   :  { %901 = vmatmul.mubr.msk.bf16.vlgmr.msra.gmra.mxu0 %vm39_vm0, %v83_v42  ;;  %v196_v42 = vsel %vm188_vm8, 0.0, %v1129_v16  ;;  %vm191_vm11 = vcmp.eq.s32.totalorder %v182_v40, %v183_v10 }
 0x20a   :  { %v133_v43 = vpop.f32.mrf.mxu0 }
 0x20c   :  { %v902_v44 = vpop.f32.mrf.mxu0 }
 0x20e   :  { %v136_v45 = vpop.f32.mrf.mxu0 }
 0x20f   :  { %v995_v46 = vpack.i.bf16 %v136_v45, %v133_v43  ;;  %v1206_v47 = vpack.c.bf16 %v136_v45, %v133_v43  ;;  %v198_v45 = vsel %vm190_vm9, 0.0, %v1129_v16 }
 0x210   :  { %v903_v48 = vpop.f32.mrf.mxu0 }
 0x211   :  { %996 = vrot.lane.b32.xlu1 %v995_v46, %s1125_s30  ;;  %991 = vrot.lane.b32.xlu0 %v995_v46, %s1126_s5 }
 0x212   :  { %912 = vmatprep.mubr.msk.bf16.mxu1 %vm212_vm2, %v1206_v47 }
 0x215   :  { %1001 = vrot.lane.b32.xlu1 %v995_v46, %s1127_s6 }
 0x283   :  { %v997_v49 = vpop.permute.xlu1 %996  ;;  %v992_v50 = vpop.permute.xlu0 %991 }
 0x284   :  { %v999_v51 = vunpack.i.h.bf16 %v997_v49  ;;  %v998_v52 = vunpack.i.l.bf16 %v997_v49  ;;  %v994_v53 = vunpack.i.h.bf16 %v992_v50  ;;  %v993_v54 = vunpack.i.l.bf16 %v992_v50 }
 0x285   :  { %v197_v50 = vsel %vm189_vm10, 0.0, %v1129_v16 }
 0x286   :  { %v1210_v55 = vpack.c.bf16 %v999_v51, %v998_v52  ;;  %v1212_v56 = vpack.c.bf16 %v994_v53, %v993_v54  ;;  %v199_v54 = vsel %vm191_vm11, 0.0, %v1129_v16 }
 0x287   :  { %v1002_v57 = vpop.permute.xlu1 %1001 }
 0x288   :  { %v1004_v58 = vunpack.i.h.bf16 %v1002_v57  ;;  %v1003_v59 = vunpack.i.l.bf16 %v1002_v57  ;;  %208 = vrot.lane.b32.xlu0 %v1210_v55, %s1128_s7  ;;  %210 = vrot.lane.b32.xlu1 %v1212_v56, %s1128_s7 }
 0x28a   :  { %v1216_v60 = vpack.c.bf16 %v1004_v58, %v1003_v59 }
 0x28c   :  { %206 = vrot.lane.b32.xlu1 %v1216_v60, %s1128_s7  ;;  %204 = vrot.lane.b32.xlu0 %v1206_v47, %s1128_s7 }
 0x2fa   :  { %v211_v61 = vpop.permute.xlu1 %210  ;;  %v209_v63 = vpop.permute.xlu0 %208 }
 0x2fb   :  { %972 = vmatprep.subr.msk.bf16.mxu1 %vm212_vm2, %v211_v61  ;;  %v235_v62 = vsel %vm212_vm2, %v211_v61, 0  ;;  %v232_v1 = vsel %vm212_vm2, %v209_v63, 0 }
 0x2fc   :  { %905 = vmatpush3.bf16.xpose.msra.mxu1 %v235_v62 }
 0x2fd   :  { %973 = vmatprep.subr.msk.bf16.mxu1 %vm212_vm2, %v209_v63 }
 0x2fe   :  { %v207_v3 = vpop.permute.xlu1 %206  ;;  %v205_v5 = vpop.permute.xlu0 %204 }
 0x2ff   :  { %v229_v4 = vsel %vm212_vm2, %v207_v3, 0  ;;  %v226_v6 = vsel %vm212_vm2, %v205_v5, 0 }
 0x304   :  { %907 = vmatpush3.bf16.xpose.msra.mxu1 %v232_v1 }
 0x305   :  { %974 = vmatprep.subr.msk.bf16.mxu1 %vm212_vm2, %v207_v3 }
 0x30c   :  { %909 = vmatpush3.bf16.xpose.msra.mxu1 %v229_v4 }
 0x30d   :  { %975 = vmatprep.subr.msk.bf16.mxu1 %vm212_vm2, %v205_v5 }
 0x314   :  { %911 = vmatpush3.bf16.xpose.msra.mxu1 %v226_v6 }
 0x315   :  { %952 = vmatprep.subr.bf16.mxu1 %v1123_v19 }
 0x31b   :  { %913 = vmatmul.mubr.msk.bf16.vlgmr.msra.gmra.mxu1 %vm212_vm2, %v1216_v60 }
 0x31c   :  { %916 = vmatprep.mubr.msk.bf16.mxu1 %vm212_vm2, %v1210_v55 }
 0x323   :  { %917 = vmatmul.mubr.msk.bf16.gmra.mxu1 %vm212_vm2, %v1212_v56 }
 0x324   :  { %968 = vmatprep.mubr.msk.bf16.mxu1 %vm1124_vm1, %v1123_v19 }
 0x3db   :  { %v914_v21 = vpop.f32.mrf.mxu1 }
 0x3dc   :  { %v280_v23 = vadd.f32 %v914_v21, %v194_v17 }
 0x3dd   :  { %v271_v26 = vpop.f32.mrf.mxu1 }
 0x3de   :  { %v272_v27 = vadd.f32 %v271_v26, %v192_v22  ;;  %v309_v29 = vsel %vm302_vm5, %v280_v23, -inf }
 0x3df   :  { %310 = vmax.xlane.f32.xlu0 %v309_v29  ;;  %v915_v33 = vpop.f32.mrf.mxu1 }
 0x3e0   :  { %v303_v35 = vsel %vm302_vm5, %v272_v27, -inf  ;;  %v283_v43 = vadd.f32 %v915_v33, %v195_v37 }
 0x3e1   :  { %v274_v38 = vpop.f32.mrf.mxu1  ;;  %304 = vmax.xlane.f32.xlu1 %v303_v35 }
 0x3e2   :  { %v275_v39 = vadd.f32 %v274_v38, %v193_v34  ;;  %v312_v52 = vsel %vm302_vm5, %v283_v43, -inf }
 0x3e3   :  { %v918_v41 = vpop.f32.mrf.mxu1 }
 0x3e4   :  { %v306_v44 = vsel %vm302_vm5, %v275_v39, -inf  ;;  %v296_v51 = vadd.f32 %v918_v41, %v198_v45 }
 0x3e5   :  { %v287_v46 = vpop.f32.mrf.mxu1  ;;  %307 = vmax.xlane.f32.xlu0 %v306_v44 }
 0x3e6   :  { %v288_v48 = vadd.f32 %v287_v46, %v196_v42  ;;  %v321_v62 = vsel %vm302_vm5, %v296_v51, -inf }
 0x3e7   :  { %v919_v49 = vpop.f32.mrf.mxu1 }
 0x3e8   :  { %v315_v53 = vsel %vm302_vm5, %v288_v48, -inf  ;;  %v299_v59 = vadd.f32 %v919_v49, %v199_v54 }
 0x3e9   :  { %v290_v57 = vpop.f32.mrf.mxu1  ;;  %313 = vmax.xlane.f32.xlu0 %v312_v52  ;;  %316 = vmax.xlane.f32.xlu1 %v315_v53 }
 0x3ea   :  { %v291_v58 = vadd.f32 %v290_v57, %v197_v50  ;;  %v324_v63 = vsel %vm302_vm5, %v299_v59, -inf }
 0x3ec   :  { %v318_v61 = vsel %vm302_vm5, %v291_v58, -inf }
 0x3ed   :  { %319 = vmax.xlane.f32.xlu0 %v318_v61  ;;  %322 = vmax.xlane.f32.xlu1 %v321_v62 }
 0x3f1   :  { %325 = vmax.xlane.f32.xlu0 %v324_v63 }
 0x3fe   :  { %401 = vrot.lane.b32.xlu1 %v1212_v56, %s1130_s8 }
 0x468   :  { %v311_v1 = vpop.xlane.xlu0 %310 }
 0x469   :  { %v329_v3 = vsub.f32 %v280_v23, %v311_v1 }
 0x46a   :  { %v305_v4 = vpop.xlane.xlu1 %304 }
 0x46b   :  { %v339_v5 = vmul.f32 1.442695, %v329_v3  ;;  %v327_v6 = vsub.f32 %v272_v27, %v305_v4 }
 0x46d   :  { %1038 = vpow2.f32 %v339_v5  ;;  %v335_v7 = vmul.f32 1.442695, %v327_v6 }
 0x46e   :  { %v308_v8 = vpop.xlane.xlu0 %307 }
 0x46f   :  { %1040 = vpow2.f32 %v335_v7  ;;  %v328_v9 = vsub.f32 %v275_v39, %v308_v8 }
 0x471   :  { %v337_v13 = vmul.f32 1.442695, %v328_v9 }
 0x472   :  { %v314_v10 = vpop.xlane.xlu0 %313  ;;  %v317_v11 = vpop.xlane.xlu1 %316 }
 0x473   :  { %v330_v12 = vsub.f32 %v283_v43, %v314_v10  ;;  %v331_v15 = vsub.f32 %v288_v48, %v317_v11 }
 0x475   :  { %v341_v14 = vmul.f32 1.442695, %v330_v12  ;;  %v343_v22 = vmul.f32 1.442695, %v331_v15  ;;  %v1022_v15 = vld [vmem:[%s1372_s2 + $0x1c] ss:$12 sps:$4 sm:$0xff]  }
 0x476   :  { %v320_v16 = vpop.xlane.xlu0 %319  ;;  %v323_v17 = vpop.xlane.xlu1 %322 }
 0x477   :  { %1042 = vpow2.f32 %v341_v14  ;;  %v333_v56 = vsub.f32 %v296_v51, %v323_v17  ;;  %v332_v18 = vsub.f32 %v291_v58, %v320_v16 }
 0x478   :  { %1044 = vpow2.f32 %v337_v13 }
 0x479   :  { %v347_v20 = vmul.f32 1.442695, %v333_v56  ;;  %v345_v29 = vmul.f32 1.442695, %v332_v18  ;;  %v1023_v56 = vld [vmem:[%s1372_s2 + $0x4] ss:$12 sps:$4 sm:$0xff]  }
 0x47a   :  { %v1256_v21 = vpop.eup %1038  ;;  %v326_v23 = vpop.xlane.xlu0 %325 }
 0x47b   :  { %v402_v24 = vpop.permute.xlu1 %401  ;;  %v334_v25 = vsub.f32 %v299_v59, %v326_v23  ;;  %v357_v26 = vsel %vm302_vm5, %v1256_v21, 0.0  ;;  %1046 = vpow2.f32 %v347_v20 }
 0x47c   :  { %920 = vmatprep.subr.bf16.mxu0 %v402_v24  ;;  %v1041_v27 = vpop.eup %1040  ;;  %358 = vadd.xlane.f32.xlu1 %v357_v26  ;;  %1048 = vpow2.f32 %v343_v22 }
 0x47d   :  { %921 = vmatpush3.bf16.msra.mxu0 %v402_v24  ;;  %v349_v31 = vmul.f32 1.442695, %v334_v25  ;;  %v351_v32 = vsel %vm302_vm5, %v1041_v27, 0.0 }
 0x47f   :  { %1050 = vpow2.f32 %v349_v31 }
 0x480   :  { %352 = vadd.xlane.f32.xlu1 %v351_v32  ;;  %1052 = vpow2.f32 %v345_v29 }
 0x484   :  { %v1043_v33 = vpop.eup %1042 }
 0x485   :  { %v360_v34 = vsel %vm302_vm5, %v1043_v33, 0.0  ;;  %v1045_v35 = vpop.eup %1044 }
 0x486   :  { %361 = vadd.xlane.f32.xlu0 %v360_v34  ;;  %v354_v37 = vsel %vm302_vm5, %v1045_v35, 0.0 }
 0x488   :  { %v1262_v36 = vpop.eup %1046 }
 0x489   :  { %v369_v38 = vsel %vm302_vm5, %v1262_v36, 0.0  ;;  %v1049_v39 = vpop.eup %1048 }
 0x48a   :  { %355 = vadd.xlane.f32.xlu0 %v354_v37  ;;  %370 = vadd.xlane.f32.xlu1 %v369_v38  ;;  %v363_v43 = vsel %vm302_vm5, %v1049_v39, 0.0 }
 0x48c   :  { %v1051_v40 = vpop.eup %1050 }
 0x48d   :  { %v372_v41 = vsel %vm302_vm5, %v1051_v40, 0.0  ;;  %v1053_v42 = vpop.eup %1052 }
 0x48e   :  { %373 = vadd.xlane.f32.xlu0 %v372_v41  ;;  %364 = vadd.xlane.f32.xlu1 %v363_v43  ;;  %v366_v44 = vsel %vm302_vm5, %v1053_v42, 0.0 }
 0x492   :  { %367 = vadd.xlane.f32.xlu0 %v366_v44 }
 0x49f   :  { %397 = vrot.lane.b32.xlu1 %v1216_v60, %s1130_s8 }
 0x4a3   :  { %395 = vrot.lane.b32.xlu1 %v1206_v47, %s1130_s8 }
 0x4a8   :  { %399 = vrot.lane.b32.xlu0 %v1210_v55, %s1130_s8 }
 0x505   :  { %v359_v45 = vpop.xlane.xlu1 %358 }
 0x509   :  { %v353_v46 = vpop.xlane.xlu1 %352 }
 0x50a   :  { %1054 = vrcp.f32 %v353_v46  ;;  %v523_v46 = vsub.s32 2, %v1197_v28 }
 0x50f   :  { %v362_v48 = vpop.xlane.xlu0 %361 }
 0x513   :  { %v356_v49 = vpop.xlane.xlu0 %355  ;;  %v371_v50 = vpop.xlane.xlu1 %370 }
 0x514   :  { %1056 = vrcp.f32 %v356_v49 }
 0x515   :  { %1058 = vrcp.f32 %v362_v48  ;;  %v524_v48 = vrot.slane %v1200_v30, %v523_v46 }
 0x516   :  { %1060 = vrcp.f32 %v359_v45 }
 0x517   :  { %v374_v51 = vpop.xlane.xlu0 %373  ;;  %v365_v52 = vpop.xlane.xlu1 %364 }
 0x518   :  { %1062 = vrcp.f32 %v365_v52  ;;  %v1055_v60 = vpop.eup %1054 }
 0x519   :  { %v383_v57 = vmul.f32 %v1055_v60, %v1041_v27 }
 0x51b   :  { %v368_v53 = vpop.xlane.xlu0 %367  ;;  %v398_v47 = vpop.permute.xlu1 %397 }
 0x51c   :  { %1064 = vrcp.f32 %v368_v53 }
 0x51d   :  { %1066 = vrcp.f32 %v374_v51 }
 0x51e   :  { %1068 = vrcp.f32 %v371_v50 }
 0x51f   :  { %v400_v54 = vpop.permute.xlu0 %399  ;;  %v396_v63 = vpop.permute.xlu1 %395 }
 0x520   :  { %922 = vmatprep.subr.bf16.mxu0 %v400_v54 }
 0x521   :  { %v1057_v55 = vpop.eup %1056  ;;  %923 = vmatpush3.bf16.msra.mxu0 %v400_v54 }
 0x522   :  { %924 = vmatprep.subr.bf16.mxu0 %v398_v47  ;;  %v384_v58 = vmul.f32 %v1057_v55, %v1045_v35  ;;  %v1059_v59 = vpop.eup %1058 }
 0x523   :  { %v1061_v62 = vpop.eup %1060  ;;  %v386_v1 = vmul.f32 %v1059_v59, %v1043_v33 }
 0x524   :  { %v391_v61 = vpack.c.bf16 %v384_v58, %v383_v57  ;;  %v385_v4 = vmul.f32 %v1061_v62, %v1256_v21 }
 0x525   :  { %925 = vmatpush3.bf16.msra.mxu0 %v398_v47  ;;  %v1063_v3 = vpop.eup %1062 }
 0x526   :  { %926 = vmatprep.subr.bf16.mxu0 %v396_v63  ;;  %928 = vmatprep.mubr.msk.bf16.mxu0 %vm302_vm5, %v391_v61  ;;  %v392_v6 = vpack.c.bf16 %v386_v1, %v385_v4  ;;  %v387_v7 = vmul.f32 %v1063_v3, %v1049_v39 }
 0x529   :  { %v1065_v5 = vpop.eup %1064  ;;  %927 = vmatpush3.bf16.msra.mxu0 %v396_v63 }
 0x52a   :  { %v388_v8 = vmul.f32 %v1065_v5, %v1053_v42  ;;  %936 = vmatprep.subr.bf16.mxu0 %v1123_v19  ;;  %v1067_v9 = vpop.eup %1066  ;;  %v1024_v5 = vld [vmem:[%s1372_s2 + $0x20] ss:$12 sps:$4 sm:$0xff]  }
 0x52b   :  { %v1069_v11 = vpop.eup %1068  ;;  %v390_v12 = vmul.f32 %v1067_v9, %v1051_v40 }
 0x52c   :  { %929 = vmatmul.mubr.msk.bf16.vlgmr.msra.gmra.mxu0 %vm302_vm5, %v392_v6  ;;  %v393_v10 = vpack.c.bf16 %v388_v8, %v387_v7  ;;  %v389_v13 = vmul.f32 %v1069_v11, %v1262_v36  ;;  %v1025_v6 = vld [vmem:[%s1372_s2 + $0x8] ss:$12 sps:$4 sm:$0xff]  }
 0x52d   :  { %937 = vmatpush3.bf16.msra.mxu0 %v1022_v15 }
 0x52e   :  { %932 = vmatprep.mubr.msk.bf16.mxu0 %vm302_vm5, %v393_v10  ;;  %v394_v14 = vpack.c.bf16 %v390_v12, %v389_v13  ;;  %938 = vmatprep.subr.bf16.mxu0 %v1123_v19  ;;  %v611_v13 = vsub.s32 3, %v1197_v28 }
 0x531   :  { %939 = vmatpush3.bf16.msra.mxu0 %v1023_v56 }
 0x532   :  { %944 = vmatprep.subr.bf16.mxu0 %v1123_v19 }
 0x534   :  { %933 = vmatmul.mubr.msk.bf16.gmra.mxu0 %vm302_vm5, %v394_v14 }
 0x535   :  { %940 = vmatprep.mubr.msk.bf16.mxu0 %vm1124_vm1, %v1123_v19 }
 0x5ec   :  { %v930_v16 = vpop.f32.mrf.mxu0 }
 0x5ee   :  { %v453_v17 = vpop.f32.mrf.mxu0 }
 0x5f0   :  { %v931_v18 = vpop.f32.mrf.mxu0 }
 0x5f1   :  { %v1005_v20 = vpack.i.bf16 %v931_v18, %v930_v16  ;;  %v612_v16 = vrot.slane %v1200_v30, %v611_v13 }
 0x5f2   :  { %v456_v21 = vpop.f32.mrf.mxu0 }
 0x5f3   :  { %1006 = vrot.lane.b32.xlu1 %v1005_v20, %s1131_s13 }
 0x5f4   :  { %v934_v22 = vpop.f32.mrf.mxu0 }
 0x5f6   :  { %v469_v23 = vpop.f32.mrf.mxu0 }
 0x5f8   :  { %v935_v24 = vpop.f32.mrf.mxu0 }
 0x5f9   :  { %v1015_v25 = vpack.i.bf16 %v935_v24, %v934_v22 }
 0x5fa   :  { %v472_v26 = vpop.f32.mrf.mxu0 }
 0x5fb   :  { %v1010_v27 = vpack.i.bf16 %v472_v26, %v469_v23  ;;  %1016 = vrot.lane.b32.xlu1 %v1015_v25, %s1132_s14  ;;  %v1026_v26 = vld [vmem:[%s1373_s3 + $0x38] sm:$0xff]  }
 0x5fc   :  { %953 = vmatpush3.bf16.msra.mxu1 %v1026_v26 }
 0x5fd   :  { %1011 = vrot.lane.b32.xlu0 %v1010_v27, %s1133_s15  ;;  %954 = vmatprep.subr.bf16.mxu1 %v1123_v19  ;;  %v1027_v27 = vld [vmem:[%s1373_s3 + $0x30] sm:$0xff]  }
 0x600   :  { %955 = vmatpush3.bf16.msra.mxu1 %v1027_v27 }
 0x601   :  { %956 = vmatprep.subr.bf16.mxu1 %v1123_v19 }
 0x665   :  { %v1007_v29 = vpop.permute.xlu1 %1006 }
 0x666   :  { %v1009_v31 = vunpack.i.h.bf16 %v1007_v29  ;;  %v1008_v32 = vunpack.i.l.bf16 %v1007_v29  ;;  %v1028_v29 = vld [vmem:[%s1373_s3 + $0x28] sm:$0xff]  }
 0x667   :  { %957 = vmatpush3.bf16.msra.mxu1 %v1028_v29 }
 0x668   :  { %v508_v37 = vsel %vm212_vm2, %v453_v17, %v1008_v32  ;;  %v509_v38 = vsel %vm212_vm2, %v456_v21, %v1009_v31  ;;  %v617_v17 = vsub.s32 4, %v1197_v28  ;;  %958 = vmatprep.subr.bf16.mxu1 %v1123_v19  ;;  %v1029_v31 = vld [vmem:[%s1373_s3 + $0x20] sm:$0xff]   ;;  %v1030_v32 = vld [vmem:[%s1373_s3 + $0x18] sm:$0xff]  }
 0x66a   :  { %v618_v21 = vrot.slane %v1200_v30, %v617_v17 }
 0x66b   :  { %959 = vmatpush3.bf16.msra.mxu1 %v1029_v31 }
 0x66c   :  { %960 = vmatprep.subr.bf16.mxu1 %v1123_v19 }
 0x66d   :  { %v1017_v33 = vpop.permute.xlu1 %1016 }
 0x66e   :  { %v1019_v39 = vunpack.i.h.bf16 %v1017_v33  ;;  %v1018_v40 = vunpack.i.l.bf16 %v1017_v33  ;;  %v1031_v33 = vld [vmem:[%s1373_s3 + $0x10] sm:$0xff]  }
 0x66f   :  { %v1012_v34 = vpop.permute.xlu0 %1011  ;;  %961 = vmatpush3.bf16.msra.mxu1 %v1030_v32 }
 0x670   :  { %v1014_v35 = vunpack.i.h.bf16 %v1012_v34  ;;  %v1013_v36 = vunpack.i.l.bf16 %v1012_v34  ;;  %962 = vmatprep.subr.bf16.mxu1 %v1123_v19  ;;  %v1032_v34 = vld [vmem:[%s1373_s3 + $0x8] sm:$0xff]  }
 0x672   :  { %v512_v41 = vsel %vm510_vm12, %v509_v38, %v1014_v35  ;;  %v511_v42 = vsel %vm510_vm12, %v508_v37, %v1013_v36  ;;  %v1033_v35 = vld [vmem:[%s1373_s3] sm:$0xff]   ;;  %v628_v36 = vsub.s32 6, %v1197_v28  ;;  %s1134_s3 = smov [#allocation5]  }
 0x673   :  { %v515_v43 = vsel %vm513_vm13, %v512_v41, %v1019_v39  ;;  %v514_v44 = vsel %vm513_vm13, %v511_v42, %v1018_v40  ;;  %963 = vmatpush3.bf16.msra.mxu1 %v1031_v33  ;;  %s823_s7 = sshll.u32 %s1134_s3, 4  ;;  %s824_s7 = int_to_ptr.vmem [resolvable:$true] %s823_s7 }
 0x674   :  { %v520_v45 = vpack.c.bf16 %v515_v43, %v514_v44  ;;  %964 = vmatprep.subr.bf16.mxu1 %v1123_v19  ;;  %v629_v37 = vrot.slane %v1200_v30, %v628_v36  ;;  %s1098_s8 = scalar_lea.vmem %s824_s7, 256  ;;  %p1103_p6 = scmp.lt.s32.totalorder %s824_s7, %s824_s7 }
 0x675   :  { %p1099_p5 = scmp.ne.s32.totalorder %s824_s7, %s1098_s8  ;;  %p1104_p7 = scmp.lt.s32.totalorder %s1098_s8, %s1098_s8 }
 0x676   :  { %941 = vmatmul.mubr.msk.bf16.vlgmr.msra.gmra.mxu0 %vm39_vm0, %v520_v45 }
 0x677   :  { %948 = vmatprep.mubr.msk.bf16.mxu0 %vm1124_vm1, %v1123_v19  ;;  %945 = vmatpush3.bf16.msra.mxu0 %v1024_v5  ;;  %p1105_p8 = por %p1104_p7, %p1103_p6 }
 0x678   :  { %946 = vmatprep.subr.bf16.mxu0 %v1123_v19  ;;  %965 = vmatpush3.bf16.msra.mxu1 %v1032_v34 }
 0x679   :  { %966 = vmatprep.subr.bf16.mxu1 %v1123_v19  ;;  %p1106_p9 = pnand %p1105_p8, %p1099_p5 }
 0x67b   :  { %947 = vmatpush3.bf16.msra.mxu0 %v1025_v6 }
 0x67c   :  { %967 = vmatpush3.bf16.msra.mxu1 %v1033_v35 }
 0x736   :  { %v574_v49 = vpop.f32.mrf.mxu0 }
 0x737   :  { %v575_v50 = vadd.f32 %v574_v49, %v524_v48 }
 0x738   :  { %v942_v51 = vpop.f32.mrf.mxu0 }
 0x739   :  { %v1302_v52 = vadd.f32 %v575_v50, %v1167_v0 }
 0x73a   :  { %v577_v53 = vpop.f32.mrf.mxu0 }
 0x73b   :  { %v578_v60 = vadd.f32 %v577_v53, %v524_v48  ;;  %v583_v47 = vsel %vm39_vm0, %v1302_v52, 0.0 }
 0x73c   :  { %584 = vadd.xlane.f32.xlu0 %v583_v47  ;;  %v943_v54 = vpop.f32.mrf.mxu0 }
 0x73d   :  { %v1307_v55 = vadd.f32 %v578_v60, %v1175_v2 }
 0x73f   :  { %v586_v57 = vsel %vm39_vm0, %v1307_v55, 0.0 }
 0x740   :  { %587 = vadd.xlane.f32.xlu1 %v586_v57 }
 0x7c5   :  { %v585_v58 = vpop.xlane.xlu0 %584 }
 0x7c6   :  { %v589_v59 = vmul.f32 0.03125, %v585_v58 }
 0x7c8   :  { %v591_v61 = vsub.f32 %v1302_v52, %v589_v59 }
 0x7c9   :  { %v588_v0 = vpop.xlane.xlu1 %587 }
 0x7ca   :  { %v590_v62 = vmul.f32 0.03125, %v588_v0  ;;  %v593_v63 = vmul.f32 %v591_v61, %v591_v61 }
 0x7cc   :  { %v592_v1 = vsub.f32 %v1307_v55, %v590_v62  ;;  %v595_v3 = vsel %vm39_vm0, %v593_v63, 0.0 }
 0x7cd   :  { %596 = vadd.xlane.f32.xlu0 %v595_v3 }
 0x7ce   :  { %v594_v4 = vmul.f32 %v592_v1, %v592_v1 }
 0x7d0   :  { %v598_v2 = vsel %vm39_vm0, %v594_v4, 0.0 }
 0x7d1   :  { %599 = vadd.xlane.f32.xlu0 %v598_v2 }
 0x856   :  { %v597_v7 = vpop.xlane.xlu0 %596 }
 0x857   :  { %v601_v8 = vmul.f32 0.03125, %v597_v7 }
 0x859   :  { %v603_v9 = vadd.f32 1e-05, %v601_v8 }
 0x85a   :  { %v600_v10 = vpop.xlane.xlu0 %599 }
 0x85b   :  { %1070 = vrsqrt.f32 %v603_v9  ;;  %v602_v11 = vmul.f32 0.03125, %v600_v10 }
 0x85d   :  { %v604_v12 = vadd.f32 1e-05, %v602_v11 }
 0x85f   :  { %1072 = vrsqrt.f32 %v604_v12 }
 0x868   :  { %v1071_v14 = vpop.eup %1070 }
 0x869   :  { %v607_v15 = vmul.f32 %v1071_v14, %v591_v61 }
 0x86b   :  { %v613_v20 = vmul.f32 %v612_v16, %v607_v15 }
 0x86c   :  { %v1073_v56 = vpop.eup %1072 }
 0x86d   :  { %v608_v18 = vmul.f32 %v1073_v56, %v592_v1  ;;  %v619_v23 = vadd.f32 %v618_v21, %v613_v20  ;;  %v723_v1 = vsub.s32 5, %v1197_v28 }
 0x86f   :  { %v614_v22 = vmul.f32 %v612_v16, %v608_v18  ;;  %v724_v3 = vrot.slane %v1200_v30, %v723_v1 }
 0x871   :  { %v620_v24 = vadd.f32 %v618_v21, %v614_v22 }
 0x873   :  { %v625_v25 = vpack.c.bf16 %v620_v24, %v619_v23 }
 0x875   :  { %949 = vmatmul.mubr.msk.bf16.vlgmr.msra.gmra.mxu0 %vm39_vm0, %v625_v25 }
 0x935   :  { %v679_v38 = vpop.f32.mrf.mxu0 }
 0x936   :  { %v680_v39 = vadd.f32 %v679_v38, %v629_v37 }
 0x937   :  { %v950_v40 = vpop.f32.mrf.mxu0 }
 0x938   :  { %v688_v41 = vmul.f32 0.044715, %v680_v39  ;;  %v686_v58 = vmul.f32 0.5, %v680_v39 }
 0x939   :  { %v682_v42 = vpop.f32.mrf.mxu0 }
 0x93a   :  { %v690_v43 = vmul.f32 %v688_v41, %v680_v39  ;;  %v683_v44 = vadd.f32 %v682_v42, %v629_v37 }
 0x93b   :  { %v951_v45 = vpop.f32.mrf.mxu0 }
 0x93c   :  { %v692_v46 = vmul.f32 %v690_v43, %v680_v39  ;;  %v689_v48 = vmul.f32 0.044715, %v683_v44  ;;  %v687_v59 = vmul.f32 0.5, %v683_v44 }
 0x93e   :  { %v694_v49 = vadd.f32 %v692_v46, %v680_v39  ;;  %v691_v50 = vmul.f32 %v689_v48, %v683_v44 }
 0x940   :  { %v696_v51 = vmul.f32 0.7978846, %v694_v49  ;;  %v693_v53 = vmul.f32 %v691_v50, %v683_v44 }
 0x942   :  { %1074 = vtanh.f32 %v696_v51  ;;  %v695_v19 = vadd.f32 %v693_v53, %v683_v44 }
 0x944   :  { %v697_v60 = vmul.f32 0.7978846, %v695_v19 }
 0x946   :  { %1076 = vtanh.f32 %v697_v60 }
 0x94f   :  { %v1075_v47 = vpop.eup %1074 }
 0x950   :  { %v700_v54 = vadd.f32 1.0, %v1075_v47 }
 0x952   :  { %v702_v0 = vmul.f32 %v700_v54, %v686_v58 }
 0x953   :  { %v1077_v57 = vpop.eup %1076 }
 0x954   :  { %v701_v61 = vadd.f32 1.0, %v1077_v57 }
 0x956   :  { %v703_v62 = vmul.f32 %v701_v61, %v687_v59 }
 0x958   :  { %v704_v63 = vpack.c.bf16 %v703_v62, %v702_v0 }
 0x95a   :  { %969 = vmatmul.mubr.bf16.vlgmr.msra.gmra.mxu1 %v704_v63 }
 0xa1a   :  { %v807_v4 = vpop.f32.mrf.mxu1 }
 0xa1b   :  { %v808_v2 = vadd.f32 %v807_v4, %v724_v3 }
 0xa1c   :  { %v970_v5 = vpop.f32.mrf.mxu1 }
 0xa1d   :  { %v814_v6 = vadd.f32 %v808_v2, %v1302_v52 }
 0xa1e   :  { %v810_v7 = vpop.f32.mrf.mxu1 }
 0xa1f   :  { %816 = vst.msk [vmem:[#allocation5] sm:$0xff] %vm39_vm0, %v814_v6  ;;  %v811_v8 = vadd.f32 %v810_v7, %v724_v3 }
 0xa20   :  { %v971_v9 = vpop.f32.mrf.mxu1 }
 0xa21   :  { %v815_v10 = vadd.f32 %v811_v8, %v1307_v55 }
 0xa23   :  { %817 = vst.msk [vmem:[#allocation5 + $0x8] sm:$0xff] %vm39_vm0, %v815_v10 }
 0xa24   :  { %1109 = shalt.err (!%p1106_p9)
}
 0xa25   :  { %s1135_s9 = smov 128  }
 0xa26   :  { %829 = dma.vmem_to_hbm [thread:$0]  %s824_s7, 256, %s1374_s4, [#allocation4], %s1135_s9, %s1135_s9, %s1131_s13  }
 0xa27   :  { %1120 = dma.done.wait [#allocation4], 256  }
 0xa28   :  { %1121 = vsyncadd [#allocation4], 4294967040 }
 0xa29   :  { %833 = vsyncpa [#allocation3], 1 }
 0xa2a   :  { %834 = vsyncpa [#allocation4], 1 }

</bundles_post_ra>
